<compile_context>
chip_gen: v7x
topology: tpu7x:2x2x1
jax: 0.10.0
libtpu: 0.0.40
codegen_flags: <defaults>
</compile_context>

<pallas_src>
import functools
import math

import numpy as np
import jax
import jax.numpy as jnp
from jax.experimental import pallas as pl
from jax.experimental.pallas import tpu as pltpu


# --------------------------------------------------------------------------- #
# Host-side weight construction (numpy -> constant-folded at trace time).     #
# --------------------------------------------------------------------------- #
def _interp_weight_matrix(in_size: int, out_size: int, align_corners: bool) -> np.ndarray:
    """(out_size, in_size) 1-D linear interpolation matrix matching
    torch.nn.functional.interpolate(mode='bilinear')."""
    i = np.arange(out_size, dtype=np.float64)
    if align_corners:
        if out_size > 1:
            src = i * (in_size - 1) / (out_size - 1)
        else:
            src = np.zeros_like(i)            # PyTorch samples index 0 here
    else:
        src = (i + 0.5) * (in_size / out_size) - 0.5
        src = np.clip(src, 0.0, float(in_size - 1))
    lo = np.clip(np.floor(src).astype(np.int64), 0, in_size - 1)
    hi = np.minimum(lo + 1, in_size - 1)
    frac = (src - lo).astype(np.float32)
    w = np.zeros((out_size, in_size), dtype=np.float32)
    np.add.at(w, (np.arange(out_size), lo), 1.0 - frac)
    np.add.at(w, (np.arange(out_size), hi), frac)
    return w


def _nearest_weight_matrix(in_size: int, out_size: int) -> np.ndarray:
    # Matches PyTorch's legacy 'nearest' (floor of i*in/out), not 'nearest-exact'.
    src = np.floor(np.arange(out_size) * (in_size / out_size)).astype(np.int64)
    src = np.clip(src, 0, in_size - 1)
    return np.eye(in_size, dtype=np.float32)[src]


# --------------------------------------------------------------------------- #
# Sizing helpers.                                                              #
# --------------------------------------------------------------------------- #
def _round_up(v: int, m: int) -> int:
    return -(-v // m) * m


def _tpu_vmem_capacity_bytes() -> int:
    try:
        info = pltpu.get_tpu_info()
        cap = int(getattr(info, "vmem_capacity_bytes", 0))
        if cap > 0:
            return cap
    except Exception:
        pass
    return 64 << 20  # conservative fallback (smallest per-TC VMEM across gens)


def _vmem_limit_bytes(est: int, cap: int) -> int:
    # ~25% headroom over our conservative estimate, never below the 32 MiB
    # scoped default, never above ~3/4 of physical VMEM.
    limit = max(int(est * 1.25) + (2 << 20), 32 << 20)
    return min(limit, int(cap * 0.75))


def _pick_block_rows(n: int, max_rows: int, align: int = 8) -> int:
    """Rows per grid step: multiple of `align`, <= max_rows (best effort), and
    small enough to give >= 2 grid steps when possible so v7x's second
    TensorCore gets work.  Tail blocks are masked by Pallas, so the result does
    not need to divide n."""
    if n <= align:
        return n
    bm = max(align, (min(max_rows, n) // align) * align)
    two_step = _round_up(_round_up(n, 2) // 2, align)   # ~ceil(n/2), aligned
    return max(align, min(bm, two_step))


# --------------------------------------------------------------------------- #
# Kernels.                                                                     #
# --------------------------------------------------------------------------- #
def _fused_interp_kernel(w_ref, x_ref, o_ref):
    # w_ref: (H*W, H_out*W_out) pre-transposed kron(Wh, Ww) weights (resident).
    # x_ref: (bm, H*W)          o_ref: (bm, H_out*W_out)  -- lane-dense store.
    o_ref[...] = jnp.dot(
        x_ref[...], w_ref[...], preferred_element_type=jnp.float32
    ).astype(o_ref.dtype)


def _separable_interp_kernel(wh_ref, wwt_ref, x_ref, o_ref):
    # wh_ref : (H_out, H_pad)   wwt_ref : (W, W_out)  (pre-transposed on host)
    # x_ref  : (bm, H_pad, W)   o_ref   : (bm, H_out, W_out)
    B, H_pad, W = x_ref.shape
    H_out = wh_ref.shape[0]
    W_out = wwt_ref.shape[1]
    wwt = wwt_ref[...]
    # W-pass: one flat (bm*H_pad, W) @ (W, W_out) MXU matmul.  H_pad % 8 == 0 is
    # guaranteed by the wrapper, so the reshapes are tile-aligned (free views).
    t = jnp.dot(x_ref[...].reshape(B * H_pad, W), wwt,
                preferred_element_type=jnp.float32)
    t = t.reshape(B, H_pad, W_out).astype(wwt.dtype)
    # H-pass: batched matmul (flash-attention style); no in-kernel transpose.
    wh_b = jnp.broadcast_to(wh_ref[...][None, :, :], (B, H_out, H_pad))
    out = jax.lax.dot_general(
        wh_b, t, dimension_numbers=(((2,), (1,)), ((0,), (0,))),
        preferred_element_type=jnp.float32)
    o_ref[...] = out.astype(o_ref.dtype)


# --------------------------------------------------------------------------- #
# Public entry point.                                                          #
# --------------------------------------------------------------------------- #
@functools.partial(jax.jit, static_argnames=("scale_factor", "mode", "align_corners"))
def interpolate(x, *, scale_factor=2, mode="bilinear", align_corners=False):
    """Pallas equivalent of Interpolate(scale_factor, mode, align_corners)(x).

    x: (N, C, H, W), NCHW (PyTorch convention).
    """
    if mode not in ("bilinear", "nearest"):
        # TODO(synk): only bilinear/nearest implemented (the module is used with bilinear).
        raise NotImplementedError(mode)

    N, C, H, W = x.shape
    H_out = int(math.floor(H * scale_factor))
    W_out = int(math.floor(W * scale_factor))
    nc = N * C
    itemsize = jnp.dtype(x.dtype).itemsize

    # bf16 inputs keep bf16 MXU operands (weights cast to bf16, f32 accumulation);
    # f32 inputs keep exact f32 compute to match F.interpolate numerics.
    compute_dtype = jnp.bfloat16 if x.dtype == jnp.bfloat16 else jnp.float32
    w_itemsize = jnp.dtype(compute_dtype).itemsize

    if mode == "bilinear":
        wh_np = _interp_weight_matrix(H, H_out, align_corners)
        ww_np = _interp_weight_matrix(W, W_out, align_corners)
    else:
        wh_np = _nearest_weight_matrix(H, H_out)
        ww_np = _nearest_weight_matrix(W, W_out)

    cap = _tpu_vmem_capacity_bytes()
    budget = min(int(cap * 0.55), 64 << 20)   # v5e/v6e: 64 MiB, v7x: ~35 MiB
    fudge = 2 << 20

    # ------------------ fused kron path (lane-dense for W_out < 128) -------- #
    kron_w_bytes = (H * W) * (H_out * W_out) * w_itemsize
    fused_weight_vmem = 2 * kron_w_bytes                          # both weight buffers
    fused_row_bytes = (2 * (H * W + H_out * W_out) * itemsize     # dbl-buffered x/out
                       + H_out * W_out * 4)                       # f32 dot result
    use_fused = (mode == "bilinear" and W_out < 128
                 and fused_weight_vmem + 8 * fused_row_bytes + fudge <= budget)

    if use_fused:
        # out[b, oh*W_out+ow] = sum_{ih,iw} x[b, ih*W+iw] * Wh[oh,ih] * Ww[ow,iw]
        w_kron_t = jnp.asarray(np.kron(wh_np, ww_np).T, dtype=compute_dtype)
        x_flat = x.reshape(nc, H * W)

        max_rows = (budget - fused_weight_vmem - fudge) // fused_row_bytes
        bm = _pick_block_rows(nc, max_rows, align=8)
        grid = (pl.cdiv(nc, bm),)

        est_vmem = fused_weight_vmem + bm * fused_row_bytes + fudge
        vmem_limit = _vmem_limit_bytes(est_vmem, cap)

        cost = pl.CostEstimate(
            flops=2 * nc * (H * W) * (H_out * W_out),
            transcendentals=0,
            bytes_accessed=nc * (H * W + H_out * W_out) * itemsize + kron_w_bytes)

        out_flat = pl.pallas_call(
            _fused_interp_kernel,
            out_shape=jax.ShapeDtypeStruct((nc, H_out * W_out), x.dtype),
            grid_spec=pltpu.PrefetchScalarGridSpec(
                num_scalar_prefetch=0,
                grid=grid,
                in_specs=[
                    pl.BlockSpec((H * W, H_out * W_out), lambda i: (0, 0)),
                    pl.BlockSpec((bm, H * W), lambda i: (i, 0)),
                ],
                out_specs=pl.BlockSpec((bm, H_out * W_out), lambda i: (i, 0)),
            ),
            compiler_params=pltpu.CompilerParams(
                dimension_semantics=("parallel",),
                vmem_limit_bytes=vmem_limit,
            ),
            cost_estimate=cost,
        )(w_kron_t, x_flat)
        return out_flat.reshape(N, C, H_out, W_out)

    # ------------------ separable path (large maps and 'nearest') ----------- #
    H_pad = _round_up(H, 8)
    if H_pad != H:
        # Pad H so the in-kernel (B,H,W)<->(B*H,W) reshapes stay (8,128)-aligned
        # (no VMEM relayout); Wh gets matching zero columns.
        wh_np = np.pad(wh_np, ((0, 0), (0, H_pad - H)))
        x3 = jnp.pad(x.reshape(nc, H, W), ((0, 0), (0, H_pad - H), (0, 0)))
    else:
        x3 = x.reshape(nc, H, W)

    wh_j = jnp.asarray(wh_np, dtype=compute_dtype)       # (H_out, H_pad)
    wwt_j = jnp.asarray(ww_np.T, dtype=compute_dtype)    # (W, W_out)

    sep_weight_vmem = 2 * (H_out * H_pad + W * W_out) * w_itemsize
    sep_row_bytes = (2 * (H_pad * W + H_out * W_out) * itemsize   # dbl-buffered x/out
                     + 2 * H_pad * W_out * 4                      # W-pass result (+reshape)
                     + H_out * W_out * 4                          # H-pass f32 result
                     + H_out * H_pad * w_itemsize)                # broadcast Wh operand
    # TODO(synk): pathological spatial sizes (weights alone ~> VMEM) would need the
    # weight matrices tiled over an extra grid axis; not needed for this model.
    # TODO(synk): for tiny nc with huge maps, a second "parallel" grid axis over
    # W_out would feed both v7x TensorCores; here we only cap bm at ~ceil(nc/2).
    max_rows = max(1, (budget - sep_weight_vmem - fudge) // sep_row_bytes)
    bm = _pick_block_rows(nc, max_rows, align=1)
    grid = (pl.cdiv(nc, bm),)

    est_vmem = sep_weight_vmem + bm * sep_row_bytes + fudge
    vmem_limit = _vmem_limit_bytes(est_vmem, cap)

    cost = pl.CostEstimate(
        flops=2 * nc * (H_pad * W * W_out + H_out * H_pad * W_out),
        transcendentals=0,
        bytes_accessed=(nc * (H_pad * W + H_out * W_out) * itemsize
                        + (H_out * H_pad + W * W_out) * w_itemsize))

    out3 = pl.pallas_call(
        _separable_interp_kernel,
        out_shape=jax.ShapeDtypeStruct((nc, H_out, W_out), x.dtype),
        grid_spec=pltpu.PrefetchScalarGridSpec(
            num_scalar_prefetch=0,
            grid=grid,
            in_specs=[
                pl.BlockSpec((H_out, H_pad), lambda i: (0, 0)),
                pl.BlockSpec((W, W_out), lambda i: (0, 0)),
                pl.BlockSpec((bm, H_pad, W), lambda i: (i, 0, 0)),
            ],
            out_specs=pl.BlockSpec((bm, H_out, W_out), lambda i: (i, 0, 0)),
        ),
        compiler_params=pltpu.CompilerParams(
            dimension_semantics=("parallel",),
            vmem_limit_bytes=vmem_limit,
        ),
        cost_estimate=cost,
    )(wh_j, wwt_j, x3)
    return out3.reshape(N, C, H_out, W_out)


# --------------------------------------------------------------------------- #
# Self-test.                                                                   #
# --------------------------------------------------------------------------- #
if __name__ == "__main__":
    def ref_bilinear(xf32, scale, align):
        _, _, h, w = xf32.shape
        wh = _interp_weight_matrix(h, int(h * scale), align)
        ww = _interp_weight_matrix(w, int(w * scale), align)
        return jnp.einsum("oh,nchw,pw->ncop", wh, xf32, ww)

    # 1) Module as used in models_nyud_CL: Interpolate(scale_factor=2, "bilinear").
    #    Fused kron path, partial tail row-block (nc=12, bm=8 -> 2 grid steps).
    x = jax.random.normal(jax.random.PRNGKey(0), (3, 4, 16, 16), dtype=jnp.float32)
    y = jax.block_until_ready(interpolate(x, scale_factor=2, mode="bilinear"))
    assert y.shape == (3, 4, 32, 32), y.shape
    assert jnp.allclose(y, ref_bilinear(x, 2, False), atol=1e-5, rtol=1e-5)

    # 2) align_corners=True variant.
    y_ac = jax.block_until_ready(
        interpolate(x, scale_factor=2, mode="bilinear", align_corners=True))
    assert jnp.allclose(y_ac, ref_bilinear(x, 2, True), atol=1e-5, rtol=1e-5)

    # 3) bf16 input -> bf16 MXU operands with f32 accumulation.
    y_bf = jax.block_until_ready(
        interpolate(x.astype(jnp.bfloat16), scale_factor=2, mode="bilinear"))
    assert y_bf.dtype == jnp.bfloat16
    assert jnp.allclose(y_bf.astype(jnp.float32), ref_bilinear(x, 2, False),
                        atol=8e-2, rtol=5e-2)

    # 4) Separable path (W_out >= 128), H not a multiple of 8 (host-side pad),
    #    partial tail row-block (nc=3, bm=2).
    x2 = jax.random.normal(jax.random.PRNGKey(1), (1, 3, 10, 70), dtype=jnp.float32)
    y2 = jax.block_until_ready(interpolate(x2, scale_factor=2, mode="bilinear"))
    assert y2.shape == (1, 3, 20, 140), y2.shape
    assert jnp.allclose(y2, ref_bilinear(x2, 2, False), atol=1e-5, rtol=1e-5)

    # 5) nearest (legacy floor semantics) with integer scale == plain repeat;
    #    exercises the separable kernel (nearest never builds the kron weight).
    xn = jax.random.normal(jax.random.PRNGKey(2), (2, 4, 16, 16), dtype=jnp.float32)
    yn = jax.block_until_ready(interpolate(xn, scale_factor=2, mode="nearest"))
    yn_ref = jnp.repeat(jnp.repeat(xn, 2, axis=2), 2, axis=3)
    assert jnp.allclose(yn, yn_ref, atol=1e-6, rtol=1e-6)

    print("KERNEL_OK")
</pallas_src>

<mosaic_0001>
module attributes {stable_mosaic.version = 11 : i64} {
  func.func @_fused_interp_kernel(%arg0: i32, %arg1: memref<256x1024xf32, #tpu.memory_space<vmem>>, %arg2: memref<8x256xf32, #tpu.memory_space<vmem>>, %arg3: memref<8x1024xf32, #tpu.memory_space<vmem>>) attributes {dimension_semantics = [#tpu.dimension_semantics<parallel>], iteration_bounds = array<i64: 2>, scalar_prefetch = 0 : i64, scratch_operands = 0 : i64, tpu.core_type = #tpu.core_type<tc>, window_params = [{pipeline_mode = #tpu.pipeline_mode<synchronous>, transform_indices = @transform_0, window_bounds = array<i64: 256, 1024>}, {transform_indices = @transform_1, window_bounds = array<i64: 8, 256>}, {transform_indices = @transform_2, window_bounds = array<i64: 8, 1024>}]} {
    %c0 = arith.constant 0 : index
    %c0_0 = arith.constant 0 : index
    %0 = vector.load %arg2[%c0, %c0_0] : memref<8x256xf32, #tpu.memory_space<vmem>>, vector<8x256xf32>
    %c0_1 = arith.constant 0 : index
    %c0_2 = arith.constant 0 : index
    %1 = vector.load %arg1[%c0_1, %c0_2] : memref<256x1024xf32, #tpu.memory_space<vmem>>, vector<256x1024xf32>
    %cst = arith.constant dense<0.000000e+00> : vector<8x1024xf32>
    %2 = tpu.matmul %0, %1, %cst {dimension_numbers = #tpu.dot_dimension_numbers<[1], [0], [0], [1], [0, 0, 1, 1], [], []>} : vector<8x256xf32>, vector<256x1024xf32>, vector<8x1024xf32> -> vector<8x1024xf32>
    %c0_3 = arith.constant 0 : index
    %c0_4 = arith.constant 0 : index
    %3 = vector.load %arg3[%c0_3, %c0_4] : memref<8x1024xf32, #tpu.memory_space<vmem>>, vector<8x1024xf32>
    tpu.vector_store %arg3[%c0_3, %c0_4], %2 {strides = array<i32>} : memref<8x1024xf32, #tpu.memory_space<vmem>>, vector<8x1024xf32>,
    return
  }
  func.func @transform_0(%arg0: i32) -> (i32, i32) {
    %c0_i32 = arith.constant 0 : i32
    %c0_i32_0 = arith.constant 0 : i32
    %c0_i32_1 = arith.constant 0 : i32
    return %c0_i32, %c0_i32_0 : i32, i32
  }
  func.func @transform_1(%arg0: i32) -> (i32, i32) {
    %c0_i32 = arith.constant 0 : i32
    %c0_i32_0 = arith.constant 0 : i32
    return %arg0, %c0_i32 : i32, i32
  }
  func.func @transform_2(%arg0: i32) -> (i32, i32) {
    %c0_i32 = arith.constant 0 : i32
    %c0_i32_0 = arith.constant 0 : i32
    return %arg0, %c0_i32 : i32, i32
  }
}

</mosaic_0001>

<bundles_post_ra>
// kernel: interpolate.1
= control target key start
LH: loop header
LB: loop body
LE: loop exit
PB: predicated region body
PF: predicated region fallthrough
CT: control target
= control target key end

     0   :  { %7 = vsyncpa [#allocation3], 0  ;;  %s1126_s9 = smov 0   ;;  %s1204_s0 = inlined_call_operand.hbm [shape: f32[256,1024], index: 0, kind: input, shape index: {}]   ;;  %s1205_s1 = inlined_call_operand.vmem [shape: f32[12,256], index: 1, kind: input, shape index: {}]   ;;  %s1206_s2 = inlined_call_operand.vmem [shape: f32[12,1024], index: 2, kind: output, shape index: {}]  }
   0x1 LB: > { %s1132_s10 = sadd.s32 4294967295, %s1106_s9   ;;  %p778_p0 = scmp.ge.s32.totalorder %s1106_s9, 1  ;;  %s1106_s9 = sphi %s1126_s9, %s13_s9  }
   0x2   : > { %p91_p1 = scmp.lt.s32.totalorder %s1106_s9, 3  ;;  %s1108_s11 = smov [#allocation2]  }
   0x3   : > { %s103_s12 = sshll.u32 %s1108_s11, 4  ;;  %p1207_p3 = scmp.eq.s32.totalorder %s1132_s10, 0  ;;  %s104_s12 = int_to_ptr.vmem [resolvable:$true] %s103_s12 }
   0x4   : > { %p1136_p2 = pnand %p778_p0, %p91_p1  ;;  %s1068_s17 = scalar_lea.hbm %s1204_s0, 32768 }
   0x5   : > { %p1069_p6 = scmp.ne.s32.totalorder %s1204_s0, %s1068_s17  ;;  %p1075_p10 = scmp.lt.u32.totalorder %s1068_s17, %s1204_s0 }
   0x6   : > { %s1209_s13 = scalar_select %p1136_p2, 1, 0 }
   0x7   : > { %p1051_p4 = pneg %p1136_p2 }
   0x9   : > { %p1145_p5 = pnand %p1207_p3, %p1051_p4 }
   0xb   : > { %p1070_p7 = pneg %p1145_p5 }
   0xd   : > { %p1071_p8 = pnand %p1070_p7, %p1069_p6 }
   0xf   : > { %p1072_p9 = pneg %p1071_p8 }
  0x11   : > { %p1077_p11 = pnand %p1075_p10, %p1072_p9 }
  0x13   : > { %1080 = shalt.err (!%p1077_p11)
}
  0x14   : > { %s1081_s22 = scalar_lea.vmem %s104_s12, 32768  ;;  %p1089_p1 = scmp.lt.s32.totalorder %s104_s12, %s104_s12 }
  0x15   : > { %p1082_p12 = scmp.ne.s32.totalorder %s104_s12, %s1081_s22  ;;  %p1090_p4 = scmp.lt.s32.totalorder %s1081_s22, %s1081_s22 }
  0x17   : > { %p1084_p13 = pnand %p1082_p12, %p1070_p7  ;;  %p1091_p3 = por %p1090_p4, %p1089_p1 }
  0x19   : > { %p1085_p0 = pneg %p1084_p13 }
  0x1b   : > { %p1092_p2 = pnand %p1091_p3, %p1085_p0 }
  0x1d   : > { %1095 = shalt.err (!%p1092_p2)
}
  0x1e   : > { %s1109_s23 = smov 1024   ;;  %s1110_s24 = smov 64  }
  0x1f   : > { %1054 = dma.hbm_to_vmem [thread:$0]  (!%p1145_p5), %s1204_s0, 32768, %s104_s12, [#allocation3], %s1109_s23, %s1109_s23, %s1110_s24  }
  0x20   : > { %p1211_p6 = scmp.ne.s32.totalorder %s1209_s13, 0 }
  0x21   : > { %p1212_p8 = scmp.eq.s32.totalorder (!%p1211_p6), %s1132_s10, 0 }
  0x22   : > { %127 = sbr.rel (%p1211_p6) target bundleno = 389 (0x185), region = 28 }
  0x29   : > { %1101 = dma.done.wait (%p1212_p8), [#allocation3], 32768   ;;  %p1213_p7 = pmov %p1212_p8 }
  0x2a   : > { %v162_v0 = vld [vmem:[#allocation2 + $0x8] sm:$0xff]  ;;  %v164_v2 = vld [vmem:[#allocation2 + $0x18] sm:$0xff]  ;;  %v161_v5 = vld [vmem:[#allocation2] sm:$0xff]  ;;  %p149_p2 = scmp.lt.s32.totalorder %s1132_s10, 1 }
  0x2b   : > { %1103 = vsyncadd (%p1213_p7), [#allocation3], 4294934528  ;;  %v170_v1 = vld [vmem:[#allocation2 + $0x48] sm:$0xff]  ;;  %v172_v4 = vld [vmem:[#allocation2 + $0x58] sm:$0xff] }
  0x2c   : > { %v791_v3 = vpack.c.bf16 %v170_v1, %v162_v0  ;;  %v169_v6 = vld [vmem:[#allocation2 + $0x40] sm:$0xff]  ;;  %v855_v7 = vpack.c.bf16 %v172_v4, %v164_v2  ;;  %v163_v9 = vld [vmem:[#allocation2 + $0x10] sm:$0xff]  ;;  %v178_v11 = vld [vmem:[#allocation2 + $0x88] sm:$0xff]  ;;  %s1215_s10 = smov (!%p149_p2, %s1132_s10), 1 }
  0x2d   : > { %v793_v8 = vpack.c.bf16 %v169_v6, %v161_v5  ;;  %v171_v10 = vld [vmem:[#allocation2 + $0x50] sm:$0xff]  ;;  %v186_v13 = vld [vmem:[#allocation2 + $0xc8] sm:$0xff]  ;;  %v180_v14 = vld [vmem:[#allocation2 + $0x98] sm:$0xff]  ;;  %s789_s27 = sshll.u32 %s1215_s10, 4  ;;  %s790_s3 = sshll.u32 %s1215_s10, 6 }
  0x2e   : > { %792 = vmatprep.subr.bf16.mxu0 %v791_v3  ;;  %v857_v12 = vpack.c.bf16 %v171_v10, %v163_v9  ;;  %v188_v15 = vld [vmem:[#allocation2 + $0xd8] sm:$0xff]  ;;  %856 = vmatprep.subr.bf16.mxu1 %v855_v7  ;;  %v795_v16 = vpack.c.bf16 %v186_v13, %v178_v11  ;;  %v177_v18 = vld [vmem:[#allocation2 + $0x80] sm:$0xff]  ;;  %v179_v20 = vld [vmem:[#allocation2 + $0x90] sm:$0xff]  ;;  %s1181_s30 = scalar_lea.vmem %s1205_s1, %s789_s27  ;;  %s158_s6 = scalar_lea.vmem %s1206_s2, %s790_s3 }
  0x2f   : > { %794 = vmatpush1.bf16.msra.mxu0 %v793_v8  ;;  %v859_v17 = vpack.c.bf16 %v188_v15, %v180_v14  ;;  %v185_v19 = vld [vmem:[#allocation2 + $0xc0] sm:$0xff]  ;;  %v187_v22 = vld [vmem:[#allocation2 + $0xd0] sm:$0xff]  ;;  %v194_v23 = vld [vmem:[#allocation2 + $0x108] sm:$0xff] }
  0x30   : > { %858 = vmatpush1.bf16.msra.mxu1 %v857_v12  ;;  %v797_v21 = vpack.c.bf16 %v185_v19, %v177_v18  ;;  %v202_v24 = vld [vmem:[#allocation2 + $0x148] sm:$0xff]  ;;  %796 = vmatprep.subr.bf16.mxu0 %v795_v16  ;;  %v861_v25 = vpack.c.bf16 %v187_v22, %v179_v20  ;;  %v196_v27 = vld [vmem:[#allocation2 + $0x118] sm:$0xff]  ;;  %v193_v29 = vld [vmem:[#allocation2 + $0x100] sm:$0xff] }
  0x31   : > { %860 = vmatprep.subr.bf16.mxu1 %v859_v17  ;;  %v799_v26 = vpack.c.bf16 %v202_v24, %v194_v23  ;;  %v204_v28 = vld [vmem:[#allocation2 + $0x158] sm:$0xff]  ;;  %v201_v31 = vld [vmem:[#allocation2 + $0x140] sm:$0xff]  ;;  %v195_v32 = vld [vmem:[#allocation2 + $0x110] sm:$0xff] }
  0x32   : > { %v863_v30 = vpack.c.bf16 %v204_v28, %v196_v27  ;;  %v203_v33 = vld [vmem:[#allocation2 + $0x150] sm:$0xff]  ;;  %v801_v34 = vpack.c.bf16 %v201_v31, %v193_v29  ;;  %v210_v35 = vld [vmem:[#allocation2 + $0x188] sm:$0xff]  ;;  %v212_v37 = vld [vmem:[#allocation2 + $0x198] sm:$0xff] }
  0x33   : > { %798 = vmatpush1.bf16.msra.mxu0 %v797_v21  ;;  %v218_v36 = vld [vmem:[#allocation2 + $0x1c8] sm:$0xff]  ;;  %v865_v38 = vpack.c.bf16 %v203_v33, %v195_v32  ;;  %v220_v40 = vld [vmem:[#allocation2 + $0x1d8] sm:$0xff]  ;;  %v209_v41 = vld [vmem:[#allocation2 + $0x180] sm:$0xff] }
  0x34   : > { %862 = vmatpush1.bf16.msra.mxu1 %v861_v25  ;;  %800 = vmatprep.subr.bf16.mxu0 %v799_v26  ;;  %v803_v39 = vpack.c.bf16 %v218_v36, %v210_v35  ;;  %v217_v42 = vld [vmem:[#allocation2 + $0x1c0] sm:$0xff]  ;;  %v867_v43 = vpack.c.bf16 %v220_v40, %v212_v37  ;;  %v211_v44 = vld [vmem:[#allocation2 + $0x190] sm:$0xff]  ;;  %v226_v46 = vld [vmem:[#allocation2 + $0x208] sm:$0xff] }
  0x35   : > { %864 = vmatprep.subr.bf16.mxu1 %v863_v30  ;;  %v219_v45 = vld [vmem:[#allocation2 + $0x1d0] sm:$0xff]  ;;  %v234_v47 = vld [vmem:[#allocation2 + $0x248] sm:$0xff]  ;;  %v228_v48 = vld [vmem:[#allocation2 + $0x218] sm:$0xff]  ;;  %v805_v50 = vpack.c.bf16 %v217_v42, %v209_v41 }
  0x36   : > { %v236_v49 = vld [vmem:[#allocation2 + $0x258] sm:$0xff]  ;;  %v869_v51 = vpack.c.bf16 %v219_v45, %v211_v44  ;;  %v807_v52 = vpack.c.bf16 %v234_v47, %v226_v46  ;;  %v225_v53 = vld [vmem:[#allocation2 + $0x200] sm:$0xff]  ;;  %v227_v55 = vld [vmem:[#allocation2 + $0x210] sm:$0xff] }
  0x37   : > { %802 = vmatpush1.bf16.msra.mxu0 %v801_v34  ;;  %v233_v54 = vld [vmem:[#allocation2 + $0x240] sm:$0xff]  ;;  %v871_v56 = vpack.c.bf16 %v236_v49, %v228_v48  ;;  %v235_v57 = vld [vmem:[#allocation2 + $0x250] sm:$0xff]  ;;  %v242_v58 = vld [vmem:[#allocation2 + $0x288] sm:$0xff] }
  0x38   : > { %866 = vmatpush1.bf16.msra.mxu1 %v865_v38  ;;  %804 = vmatprep.subr.bf16.mxu0 %v803_v39  ;;  %v250_v59 = vld [vmem:[#allocation2 + $0x2c8] sm:$0xff]  ;;  %v244_v60 = vld [vmem:[#allocation2 + $0x298] sm:$0xff]  ;;  %v809_v62 = vpack.c.bf16 %v233_v54, %v225_v53  ;;  %v873_v63 = vpack.c.bf16 %v235_v57, %v227_v55  ;;  %v241_v1 = vld [vmem:[#allocation2 + $0x280] sm:$0xff] }
  0x39   : > { %868 = vmatprep.subr.bf16.mxu1 %v867_v43  ;;  %v252_v61 = vld [vmem:[#allocation2 + $0x2d8] sm:$0xff]  ;;  %v811_v0 = vpack.c.bf16 %v250_v59, %v242_v58  ;;  %v249_v2 = vld [vmem:[#allocation2 + $0x2c0] sm:$0xff]  ;;  %v243_v3 = vld [vmem:[#allocation2 + $0x290] sm:$0xff] }
  0x3a   : > { %v875_v4 = vpack.c.bf16 %v252_v61, %v244_v60  ;;  %v251_v5 = vld [vmem:[#allocation2 + $0x2d0] sm:$0xff]  ;;  %v258_v6 = vld [vmem:[#allocation2 + $0x308] sm:$0xff]  ;;  %v260_v8 = vld [vmem:[#allocation2 + $0x318] sm:$0xff]  ;;  %v813_v10 = vpack.c.bf16 %v249_v2, %v241_v1 }
  0x3b   : > { %806 = vmatpush1.bf16.msra.mxu0 %v805_v50  ;;  %v266_v7 = vld [vmem:[#allocation2 + $0x348] sm:$0xff]  ;;  %v268_v9 = vld [vmem:[#allocation2 + $0x358] sm:$0xff]  ;;  %v877_v11 = vpack.c.bf16 %v251_v5, %v243_v3  ;;  %v257_v13 = vld [vmem:[#allocation2 + $0x300] sm:$0xff] }
  0x3c   : > { %870 = vmatpush1.bf16.msra.mxu1 %v869_v51  ;;  %808 = vmatprep.subr.bf16.mxu0 %v807_v52  ;;  %v815_v12 = vpack.c.bf16 %v266_v7, %v258_v6  ;;  %v265_v14 = vld [vmem:[#allocation2 + $0x340] sm:$0xff]  ;;  %v259_v15 = vld [vmem:[#allocation2 + $0x310] sm:$0xff]  ;;  %v879_v16 = vpack.c.bf16 %v268_v9, %v260_v8  ;;  %v274_v18 = vld [vmem:[#allocation2 + $0x388] sm:$0xff] }
  0x3d   : > { %872 = vmatprep.subr.bf16.mxu1 %v871_v56  ;;  %v267_v17 = vld [vmem:[#allocation2 + $0x350] sm:$0xff]  ;;  %v282_v19 = vld [vmem:[#allocation2 + $0x3c8] sm:$0xff]  ;;  %v276_v20 = vld [vmem:[#allocation2 + $0x398] sm:$0xff]  ;;  %v817_v22 = vpack.c.bf16 %v265_v14, %v257_v13 }
  0x3e   : > { %v284_v21 = vld [vmem:[#allocation2 + $0x3d8] sm:$0xff]  ;;  %v881_v23 = vpack.c.bf16 %v267_v17, %v259_v15  ;;  %v819_v24 = vpack.c.bf16 %v282_v19, %v274_v18  ;;  %v273_v25 = vld [vmem:[#allocation2 + $0x380] sm:$0xff]  ;;  %v275_v27 = vld [vmem:[#allocation2 + $0x390] sm:$0xff] }
  0x3f   : > { %810 = vmatpush1.bf16.msra.mxu0 %v809_v62  ;;  %v281_v26 = vld [vmem:[#allocation2 + $0x3c0] sm:$0xff]  ;;  %v883_v28 = vpack.c.bf16 %v284_v21, %v276_v20  ;;  %v283_v29 = vld [vmem:[#allocation2 + $0x3d0] sm:$0xff]  ;;  %v290_v30 = vld [vmem:[#allocation2 + $0x408] sm:$0xff] }
  0x40   : > { %874 = vmatpush1.bf16.msra.mxu1 %v873_v63  ;;  %812 = vmatprep.subr.bf16.mxu0 %v811_v0  ;;  %v298_v31 = vld [vmem:[#allocation2 + $0x448] sm:$0xff]  ;;  %v292_v32 = vld [vmem:[#allocation2 + $0x418] sm:$0xff]  ;;  %v821_v34 = vpack.c.bf16 %v281_v26, %v273_v25  ;;  %v885_v35 = vpack.c.bf16 %v283_v29, %v275_v27  ;;  %v289_v37 = vld [vmem:[#allocation2 + $0x400] sm:$0xff] }
  0x41   : > { %876 = vmatprep.subr.bf16.mxu1 %v875_v4  ;;  %v300_v33 = vld [vmem:[#allocation2 + $0x458] sm:$0xff]  ;;  %v823_v36 = vpack.c.bf16 %v298_v31, %v290_v30  ;;  %v297_v38 = vld [vmem:[#allocation2 + $0x440] sm:$0xff]  ;;  %v291_v39 = vld [vmem:[#allocation2 + $0x410] sm:$0xff] }
  0x42   : > { %v887_v40 = vpack.c.bf16 %v300_v33, %v292_v32  ;;  %v299_v41 = vld [vmem:[#allocation2 + $0x450] sm:$0xff]  ;;  %v306_v42 = vld [vmem:[#allocation2 + $0x488] sm:$0xff]  ;;  %v308_v44 = vld [vmem:[#allocation2 + $0x498] sm:$0xff]  ;;  %v825_v46 = vpack.c.bf16 %v297_v38, %v289_v37 }
  0x43   : > { %814 = vmatpush1.bf16.msra.mxu0 %v813_v10  ;;  %v314_v43 = vld [vmem:[#allocation2 + $0x4c8] sm:$0xff]  ;;  %v316_v45 = vld [vmem:[#allocation2 + $0x4d8] sm:$0xff]  ;;  %v889_v47 = vpack.c.bf16 %v299_v41, %v291_v39  ;;  %v305_v49 = vld [vmem:[#allocation2 + $0x480] sm:$0xff] }
  0x44   : > { %878 = vmatpush1.bf16.msra.mxu1 %v877_v11  ;;  %816 = vmatprep.subr.bf16.mxu0 %v815_v12  ;;  %v827_v48 = vpack.c.bf16 %v314_v43, %v306_v42  ;;  %v313_v50 = vld [vmem:[#allocation2 + $0x4c0] sm:$0xff]  ;;  %v307_v51 = vld [vmem:[#allocation2 + $0x490] sm:$0xff]  ;;  %v891_v52 = vpack.c.bf16 %v316_v45, %v308_v44  ;;  %v322_v54 = vld [vmem:[#allocation2 + $0x508] sm:$0xff] }
  0x45   : > { %880 = vmatprep.subr.bf16.mxu1 %v879_v16  ;;  %v315_v53 = vld [vmem:[#allocation2 + $0x4d0] sm:$0xff]  ;;  %v330_v55 = vld [vmem:[#allocation2 + $0x548] sm:$0xff]  ;;  %v324_v56 = vld [vmem:[#allocation2 + $0x518] sm:$0xff]  ;;  %v829_v58 = vpack.c.bf16 %v313_v50, %v305_v49 }
  0x46   : > { %v332_v57 = vld [vmem:[#allocation2 + $0x558] sm:$0xff]  ;;  %v893_v59 = vpack.c.bf16 %v315_v53, %v307_v51  ;;  %v831_v60 = vpack.c.bf16 %v330_v55, %v322_v54  ;;  %v321_v61 = vld [vmem:[#allocation2 + $0x500] sm:$0xff]  ;;  %v323_v63 = vld [vmem:[#allocation2 + $0x510] sm:$0xff] }
  0x47   : > { %818 = vmatpush1.bf16.msra.mxu0 %v817_v22  ;;  %v329_v62 = vld [vmem:[#allocation2 + $0x540] sm:$0xff]  ;;  %v895_v0 = vpack.c.bf16 %v332_v57, %v324_v56  ;;  %v331_v1 = vld [vmem:[#allocation2 + $0x550] sm:$0xff]  ;;  %v338_v2 = vld [vmem:[#allocation2 + $0x588] sm:$0xff] }
  0x48   : > { %882 = vmatpush1.bf16.msra.mxu1 %v881_v23  ;;  %820 = vmatprep.subr.bf16.mxu0 %v819_v24  ;;  %v346_v3 = vld [vmem:[#allocation2 + $0x5c8] sm:$0xff]  ;;  %v340_v4 = vld [vmem:[#allocation2 + $0x598] sm:$0xff]  ;;  %v833_v6 = vpack.c.bf16 %v329_v62, %v321_v61  ;;  %v337_v7 = vld [vmem:[#allocation2 + $0x580] sm:$0xff]  ;;  %v897_v8 = vpack.c.bf16 %v331_v1, %v323_v63 }
  0x49   : > { %884 = vmatprep.subr.bf16.mxu1 %v883_v28  ;;  %v348_v5 = vld [vmem:[#allocation2 + $0x5d8] sm:$0xff]  ;;  %v835_v9 = vpack.c.bf16 %v346_v3, %v338_v2  ;;  %v345_v10 = vld [vmem:[#allocation2 + $0x5c0] sm:$0xff]  ;;  %v339_v11 = vld [vmem:[#allocation2 + $0x590] sm:$0xff] }
  0x4a   : > { %v347_v12 = vld [vmem:[#allocation2 + $0x5d0] sm:$0xff]  ;;  %v899_v13 = vpack.c.bf16 %v348_v5, %v340_v4  ;;  %v354_v14 = vld [vmem:[#allocation2 + $0x608] sm:$0xff]  ;;  %v356_v17 = vld [vmem:[#allocation2 + $0x618] sm:$0xff]  ;;  %v837_v19 = vpack.c.bf16 %v345_v10, %v337_v7 }
  0x4b   : > { %822 = vmatpush1.bf16.msra.mxu0 %v821_v34  ;;  %v362_v15 = vld [vmem:[#allocation2 + $0x648] sm:$0xff]  ;;  %v364_v18 = vld [vmem:[#allocation2 + $0x658] sm:$0xff]  ;;  %v901_v20 = vpack.c.bf16 %v347_v12, %v339_v11  ;;  %v353_v22 = vld [vmem:[#allocation2 + $0x600] sm:$0xff] }
  0x4c   : > { %886 = vmatpush1.bf16.msra.mxu1 %v885_v35  ;;  %824 = vmatprep.subr.bf16.mxu0 %v823_v36  ;;  %v1184_v16 = vld [vmem:[%s1181_s30 + $0x8] sm:$0xff]  ;;  %v839_v21 = vpack.c.bf16 %v362_v15, %v354_v14  ;;  %v361_v23 = vld [vmem:[#allocation2 + $0x640] sm:$0xff]  ;;  %v355_v24 = vld [vmem:[#allocation2 + $0x610] sm:$0xff]  ;;  %v903_v25 = vpack.c.bf16 %v364_v18, %v356_v17 }
  0x4d   : > { %888 = vmatprep.subr.bf16.mxu1 %v887_v40  ;;  %481 = vmatprep.mubr.f32.mxu0 %v1184_v16  ;;  %v363_v26 = vld [vmem:[#allocation2 + $0x650] sm:$0xff]  ;;  %v370_v27 = vld [vmem:[#allocation2 + $0x688] sm:$0xff]  ;;  %v372_v29 = vld [vmem:[#allocation2 + $0x698] sm:$0xff]  ;;  %v841_v31 = vpack.c.bf16 %v361_v23, %v353_v22 }
  0x4e   : > { %552 = vmatprep.mubr.f32.mxu1 %v1184_v16  ;;  %v378_v28 = vld [vmem:[#allocation2 + $0x6c8] sm:$0xff]  ;;  %v380_v30 = vld [vmem:[#allocation2 + $0x6d8] sm:$0xff]  ;;  %v905_v32 = vpack.c.bf16 %v363_v26, %v355_v24  ;;  %v369_v34 = vld [vmem:[#allocation2 + $0x680] sm:$0xff] }
  0x4f   : > { %826 = vmatpush1.bf16.msra.mxu0 %v825_v46  ;;  %v843_v33 = vpack.c.bf16 %v378_v28, %v370_v27  ;;  %v377_v35 = vld [vmem:[#allocation2 + $0x6c0] sm:$0xff]  ;;  %v371_v36 = vld [vmem:[#allocation2 + $0x690] sm:$0xff]  ;;  %v907_v37 = vpack.c.bf16 %v380_v30, %v372_v29  ;;  %v386_v39 = vld [vmem:[#allocation2 + $0x708] sm:$0xff] }
  0x50   : > { %890 = vmatpush1.bf16.msra.mxu1 %v889_v47  ;;  %828 = vmatprep.subr.bf16.mxu0 %v827_v48  ;;  %v379_v38 = vld [vmem:[#allocation2 + $0x6d0] sm:$0xff]  ;;  %v394_v40 = vld [vmem:[#allocation2 + $0x748] sm:$0xff]  ;;  %v388_v41 = vld [vmem:[#allocation2 + $0x718] sm:$0xff]  ;;  %v845_v43 = vpack.c.bf16 %v377_v35, %v369_v34 }
  0x51   : > { %892 = vmatprep.subr.bf16.mxu1 %v891_v52  ;;  %v396_v42 = vld [vmem:[#allocation2 + $0x758] sm:$0xff]  ;;  %v909_v44 = vpack.c.bf16 %v379_v38, %v371_v36  ;;  %v847_v45 = vpack.c.bf16 %v394_v40, %v386_v39  ;;  %v385_v46 = vld [vmem:[#allocation2 + $0x700] sm:$0xff]  ;;  %v387_v48 = vld [vmem:[#allocation2 + $0x710] sm:$0xff] }
  0x52   : > { %v393_v47 = vld [vmem:[#allocation2 + $0x740] sm:$0xff]  ;;  %v911_v49 = vpack.c.bf16 %v396_v42, %v388_v41  ;;  %v395_v50 = vld [vmem:[#allocation2 + $0x750] sm:$0xff]  ;;  %v402_v51 = vld [vmem:[#allocation2 + $0x788] sm:$0xff] }
  0x53   : > { %830 = vmatpush1.bf16.msra.mxu0 %v829_v58  ;;  %v410_v52 = vld [vmem:[#allocation2 + $0x7c8] sm:$0xff]  ;;  %v404_v53 = vld [vmem:[#allocation2 + $0x798] sm:$0xff]  ;;  %v849_v55 = vpack.c.bf16 %v393_v47, %v385_v46  ;;  %v913_v56 = vpack.c.bf16 %v395_v50, %v387_v48  ;;  %v401_v58 = vld [vmem:[#allocation2 + $0x780] sm:$0xff] }
  0x54   : > { %894 = vmatpush1.bf16.msra.mxu1 %v893_v59  ;;  %832 = vmatprep.subr.bf16.mxu0 %v831_v60  ;;  %v412_v54 = vld [vmem:[#allocation2 + $0x7d8] sm:$0xff]  ;;  %v851_v57 = vpack.c.bf16 %v410_v52, %v402_v51  ;;  %v409_v59 = vld [vmem:[#allocation2 + $0x7c0] sm:$0xff]  ;;  %v403_v60 = vld [vmem:[#allocation2 + $0x790] sm:$0xff] }
  0x55   : > { %896 = vmatprep.subr.bf16.mxu1 %v895_v0  ;;  %v915_v61 = vpack.c.bf16 %v412_v54, %v404_v53  ;;  %v411_v62 = vld [vmem:[#allocation2 + $0x7d0] sm:$0xff]  ;;  %v166_v63 = vld [vmem:[#allocation2 + $0x28] sm:$0xff]  ;;  %v168_v1 = vld [vmem:[#allocation2 + $0x38] sm:$0xff]  ;;  %v853_v3 = vpack.c.bf16 %v409_v59, %v401_v58 }
  0x56   : > { %v174_v0 = vld [vmem:[#allocation2 + $0x68] sm:$0xff]  ;;  %v176_v2 = vld [vmem:[#allocation2 + $0x78] sm:$0xff]  ;;  %v917_v4 = vpack.c.bf16 %v411_v62, %v403_v60  ;;  %v173_v7 = vld [vmem:[#allocation2 + $0x60] sm:$0xff] }
  0x57   : > { %834 = vmatpush1.bf16.msra.mxu0 %v833_v6  ;;  %v919_v5 = vpack.c.bf16 %v174_v0, %v166_v63  ;;  %v165_v6 = vld [vmem:[#allocation2 + $0x20] sm:$0xff]  ;;  %v175_v10 = vld [vmem:[#allocation2 + $0x70] sm:$0xff]  ;;  %v182_v11 = vld [vmem:[#allocation2 + $0xa8] sm:$0xff] }
  0x58   : > { %898 = vmatpush1.bf16.msra.mxu1 %v897_v8  ;;  %836 = vmatprep.subr.bf16.mxu0 %v835_v9  ;;  %v167_v8 = vld [vmem:[#allocation2 + $0x30] sm:$0xff]  ;;  %v983_v9 = vpack.c.bf16 %v176_v2, %v168_v1  ;;  %v190_v12 = vld [vmem:[#allocation2 + $0xe8] sm:$0xff]  ;;  %v192_v14 = vld [vmem:[#allocation2 + $0xf8] sm:$0xff]  ;;  %v921_v17 = vpack.c.bf16 %v173_v7, %v165_v6 }
  0x59   : > { %900 = vmatprep.subr.bf16.mxu1 %v899_v13  ;;  %v184_v13 = vld [vmem:[#allocation2 + $0xb8] sm:$0xff]  ;;  %v1189_v15 = vld [vmem:[%s1181_s30] sm:$0xff]  ;;  %v985_v18 = vpack.c.bf16 %v175_v10, %v167_v8  ;;  %v183_v22 = vld [vmem:[#allocation2 + $0xb0] sm:$0xff] }
  0x5a   : > { %v987_v23 = vpack.c.bf16 %v192_v14, %v184_v13  ;;  %v191_v24 = vld [vmem:[#allocation2 + $0xf0] sm:$0xff]  ;;  %v206_v26 = vld [vmem:[#allocation2 + $0x168] sm:$0xff]  ;;  %v200_v27 = vld [vmem:[#allocation2 + $0x138] sm:$0xff] }
  0x5b   : > { %838 = vmatpush1.bf16.msra.mxu0 %v837_v19  ;;  %v923_v19 = vpack.c.bf16 %v190_v12, %v182_v11  ;;  %v208_v28 = vld [vmem:[#allocation2 + $0x178] sm:$0xff]  ;;  %v989_v30 = vpack.c.bf16 %v191_v24, %v183_v22  ;;  %v199_v34 = vld [vmem:[#allocation2 + $0x130] sm:$0xff]  ;;  %v222_v38 = vld [vmem:[#allocation2 + $0x1e8] sm:$0xff] }
  0x5c   : > { %902 = vmatpush1.bf16.msra.mxu1 %v901_v20  ;;  %840 = vmatprep.subr.bf16.mxu0 %v839_v21  ;;  %v181_v20 = vld [vmem:[#allocation2 + $0xa0] sm:$0xff]  ;;  %v991_v35 = vpack.c.bf16 %v208_v28, %v200_v27  ;;  %v207_v36 = vld [vmem:[#allocation2 + $0x170] sm:$0xff]  ;;  %v216_v39 = vld [vmem:[#allocation2 + $0x1b8] sm:$0xff] }
  0x5d   : > { %904 = vmatprep.subr.bf16.mxu1 %v903_v25  ;;  %v189_v21 = vld [vmem:[#allocation2 + $0xe0] sm:$0xff]  ;;  %v198_v25 = vld [vmem:[#allocation2 + $0x128] sm:$0xff]  ;;  %v224_v40 = vld [vmem:[#allocation2 + $0x1f8] sm:$0xff]  ;;  %v993_v42 = vpack.c.bf16 %v207_v36, %v199_v34 }
  0x5e   : > { %v925_v29 = vpack.c.bf16 %v189_v21, %v181_v20  ;;  %v215_v46 = vld [vmem:[#allocation2 + $0x1b0] sm:$0xff]  ;;  %v995_v47 = vpack.c.bf16 %v224_v40, %v216_v39  ;;  %v238_v50 = vld [vmem:[#allocation2 + $0x268] sm:$0xff]  ;;  %v232_v51 = vld [vmem:[#allocation2 + $0x238] sm:$0xff] }
  0x5f   : > { %842 = vmatpush1.bf16.msra.mxu0 %v841_v31  ;;  %v927_v31 = vpack.c.bf16 %v206_v26, %v198_v25  ;;  %v223_v48 = vld [vmem:[#allocation2 + $0x1f0] sm:$0xff]  ;;  %v240_v52 = vld [vmem:[#allocation2 + $0x278] sm:$0xff]  ;;  %v246_v60 = vld [vmem:[#allocation2 + $0x2a8] sm:$0xff] }
  0x60   : > { %906 = vmatpush1.bf16.msra.mxu1 %v905_v32  ;;  %844 = vmatprep.subr.bf16.mxu0 %v843_v33  ;;  %v197_v32 = vld [vmem:[#allocation2 + $0x120] sm:$0xff]  ;;  %v999_v58 = vpack.c.bf16 %v240_v52, %v232_v51  ;;  %v239_v59 = vld [vmem:[#allocation2 + $0x270] sm:$0xff]  ;;  %v248_v62 = vld [vmem:[#allocation2 + $0x2b8] sm:$0xff] }
  0x61   : > { %908 = vmatprep.subr.bf16.mxu1 %v907_v37  ;;  %v205_v33 = vld [vmem:[#allocation2 + $0x160] sm:$0xff]  ;;  %v214_v37 = vld [vmem:[#allocation2 + $0x1a8] sm:$0xff]  ;;  %v256_v63 = vld [vmem:[#allocation2 + $0x2f8] sm:$0xff] }
  0x62   : > { %v929_v41 = vpack.c.bf16 %v205_v33, %v197_v32  ;;  %v1003_v6 = vpack.c.bf16 %v256_v63, %v248_v62  ;;  %v255_v7 = vld [vmem:[#allocation2 + $0x2f0] sm:$0xff]  ;;  %v262_v8 = vld [vmem:[#allocation2 + $0x328] sm:$0xff]  ;;  %v264_v10 = vld [vmem:[#allocation2 + $0x338] sm:$0xff] }
  0x63   : > { %846 = vmatpush1.bf16.msra.mxu0 %v845_v43  ;;  %v931_v43 = vpack.c.bf16 %v222_v38, %v214_v37  ;;  %v272_v11 = vld [vmem:[#allocation2 + $0x378] sm:$0xff]  ;;  %v271_v21 = vld [vmem:[#allocation2 + $0x370] sm:$0xff]  ;;  %v278_v22 = vld [vmem:[#allocation2 + $0x3a8] sm:$0xff] }
  0x64   : > { %910 = vmatpush1.bf16.msra.mxu1 %v909_v44  ;;  %848 = vmatprep.subr.bf16.mxu0 %v847_v45  ;;  %v213_v44 = vld [vmem:[#allocation2 + $0x1a0] sm:$0xff]  ;;  %v1007_v20 = vpack.c.bf16 %v272_v11, %v264_v10  ;;  %v280_v24 = vld [vmem:[#allocation2 + $0x3b8] sm:$0xff]  ;;  %v287_v33 = vld [vmem:[#allocation2 + $0x3f0] sm:$0xff] }
  0x65   : > { %912 = vmatprep.subr.bf16.mxu1 %v911_v49  ;;  %v221_v45 = vld [vmem:[#allocation2 + $0x1e0] sm:$0xff]  ;;  %v230_v49 = vld [vmem:[#allocation2 + $0x228] sm:$0xff]  ;;  %v288_v25 = vld [vmem:[#allocation2 + $0x3f8] sm:$0xff] }
  0x66   : > { %v933_v53 = vpack.c.bf16 %v221_v45, %v213_v44  ;;  %v935_v54 = vpack.c.bf16 %v238_v50, %v230_v49  ;;  %v1011_v32 = vpack.c.bf16 %v288_v25, %v280_v24  ;;  %v294_v34 = vld [vmem:[#allocation2 + $0x428] sm:$0xff]  ;;  %v296_v36 = vld [vmem:[#allocation2 + $0x438] sm:$0xff]  ;;  %v303_v45 = vld [vmem:[#allocation2 + $0x470] sm:$0xff] }
  0x67   : > { %850 = vmatpush1.bf16.msra.mxu0 %v849_v55  ;;  %v229_v55 = vld [vmem:[#allocation2 + $0x220] sm:$0xff]  ;;  %v304_v37 = vld [vmem:[#allocation2 + $0x478] sm:$0xff] }
  0x68   : > { %914 = vmatpush1.bf16.msra.mxu1 %v913_v56  ;;  %852 = vmatprep.subr.bf16.mxu0 %v851_v57  ;;  %v237_v56 = vld [vmem:[#allocation2 + $0x260] sm:$0xff]  ;;  %v231_v57 = vld [vmem:[#allocation2 + $0x230] sm:$0xff]  ;;  %v1015_v44 = vpack.c.bf16 %v304_v37, %v296_v36  ;;  %v320_v49 = vld [vmem:[#allocation2 + $0x4f8] sm:$0xff] }
  0x69   : > { %916 = vmatprep.subr.bf16.mxu1 %v915_v61  ;;  %v254_v61 = vld [vmem:[#allocation2 + $0x2e8] sm:$0xff]  ;;  %v937_v0 = vpack.c.bf16 %v237_v56, %v229_v55  ;;  %v1001_v1 = vpack.c.bf16 %v239_v59, %v231_v57  ;;  %v319_v56 = vld [vmem:[#allocation2 + $0x4f0] sm:$0xff]  ;;  %v328_v59 = vld [vmem:[#allocation2 + $0x538] sm:$0xff] }
  0x6a   : > { %v939_v2 = vpack.c.bf16 %v254_v61, %v246_v60  ;;  %v326_v57 = vld [vmem:[#allocation2 + $0x528] sm:$0xff]  ;;  %v336_v60 = vld [vmem:[#allocation2 + $0x578] sm:$0xff] }
  0x6b   : > { %854 = vmatpush1.bf16.msra.mxu0 %v853_v3  ;;  %v245_v3 = vld [vmem:[#allocation2 + $0x2a0] sm:$0xff] }
  0x6c   : > { %918 = vmatpush1.bf16.msra.mxu1 %v917_v4  ;;  %920 = vmatprep.subr.bf16.mxu0 %v919_v5  ;;  %v253_v4 = vld [vmem:[#allocation2 + $0x2e0] sm:$0xff]  ;;  %v247_v5 = vld [vmem:[#allocation2 + $0x2b0] sm:$0xff] }
  0x6d   : > { %984 = vmatprep.subr.bf16.mxu1 %v983_v9  ;;  %v270_v9 = vld [vmem:[#allocation2 + $0x368] sm:$0xff]  ;;  %v941_v12 = vpack.c.bf16 %v253_v4, %v245_v3  ;;  %v1005_v13 = vpack.c.bf16 %v255_v7, %v247_v5  ;;  %v1023_v3 = vpack.c.bf16 %v336_v60, %v328_v59  ;;  %v335_v4 = vld [vmem:[#allocation2 + $0x570] sm:$0xff]  ;;  %v344_v7 = vld [vmem:[#allocation2 + $0x5b8] sm:$0xff] }
  0x6e   : > { %482 = vmatmul.mubr.f32.vlgmr.msra.gmra.mrb[0].mxu0 %v1189_v15  ;;  %v943_v14 = vpack.c.bf16 %v270_v9, %v262_v8  ;;  %v342_v5 = vld [vmem:[#allocation2 + $0x5a8] sm:$0xff]  ;;  %v352_v8 = vld [vmem:[#allocation2 + $0x5f8] sm:$0xff] }
  0x6f   : > { %553 = vmatmul.mubr.f32.vlgmr.msra.gmra.mrb[0].mxu1 %v1189_v15  ;;  %922 = vmatpush1.bf16.msra.mxu0 %v921_v17  ;;  %v261_v17 = vld [vmem:[#allocation2 + $0x320] sm:$0xff] }
  0x70   : > { %986 = vmatpush1.bf16.msra.mxu1 %v985_v18  ;;  %924 = vmatprep.subr.bf16.mxu0 %v923_v19  ;;  %v269_v18 = vld [vmem:[#allocation2 + $0x360] sm:$0xff]  ;;  %v263_v19 = vld [vmem:[#allocation2 + $0x330] sm:$0xff] }
  0x71   : > { %988 = vmatprep.subr.bf16.mxu1 %v987_v23  ;;  %623 = vmatprep.mubr.f32.mxu0 %v1184_v16  ;;  %v286_v23 = vld [vmem:[#allocation2 + $0x3e8] sm:$0xff]  ;;  %v945_v26 = vpack.c.bf16 %v269_v18, %v261_v17  ;;  %v1009_v27 = vpack.c.bf16 %v271_v21, %v263_v19  ;;  %v1027_v17 = vpack.c.bf16 %v352_v8, %v344_v7  ;;  %v351_v18 = vld [vmem:[#allocation2 + $0x5f0] sm:$0xff]  ;;  %v360_v21 = vld [vmem:[#allocation2 + $0x638] sm:$0xff] }
  0x72   : > { %694 = vmatprep.mubr.f32.mxu1 %v1184_v16  ;;  %v997_v16 = vpack.c.bf16 %v223_v48, %v215_v46  ;;  %v947_v28 = vpack.c.bf16 %v286_v23, %v278_v22  ;;  %v310_v46 = vld [vmem:[#allocation2 + $0x4a8] sm:$0xff]  ;;  %v312_v48 = vld [vmem:[#allocation2 + $0x4b8] sm:$0xff] }
  0x73   : > { %926 = vmatpush1.bf16.msra.mxu0 %v925_v29  ;;  %v277_v29 = vld [vmem:[#allocation2 + $0x3a0] sm:$0xff]  ;;  %v1019_v55 = vpack.c.bf16 %v320_v49, %v312_v48  ;;  %v358_v19 = vld [vmem:[#allocation2 + $0x628] sm:$0xff]  ;;  %v368_v22 = vld [vmem:[#allocation2 + $0x678] sm:$0xff] }
  0x74   : > { %990 = vmatpush1.bf16.msra.mxu1 %v989_v30  ;;  %928 = vmatprep.subr.bf16.mxu0 %v927_v31  ;;  %v285_v30 = vld [vmem:[#allocation2 + $0x3e0] sm:$0xff]  ;;  %v279_v31 = vld [vmem:[#allocation2 + $0x3b0] sm:$0xff] }
  0x75   : > { %992 = vmatprep.subr.bf16.mxu1 %v991_v35  ;;  %v302_v35 = vld [vmem:[#allocation2 + $0x468] sm:$0xff]  ;;  %v949_v38 = vpack.c.bf16 %v285_v30, %v277_v29  ;;  %v1013_v39 = vpack.c.bf16 %v287_v33, %v279_v31  ;;  %v1031_v29 = vpack.c.bf16 %v368_v22, %v360_v21  ;;  %v367_v30 = vld [vmem:[#allocation2 + $0x670] sm:$0xff]  ;;  %v376_v33 = vld [vmem:[#allocation2 + $0x6b8] sm:$0xff] }
  0x76   : > { %v951_v40 = vpack.c.bf16 %v302_v35, %v294_v34  ;;  %v374_v31 = vld [vmem:[#allocation2 + $0x6a8] sm:$0xff]  ;;  %v384_v34 = vld [vmem:[#allocation2 + $0x6f8] sm:$0xff] }
  0x77   : > { %930 = vmatpush1.bf16.msra.mxu0 %v929_v41  ;;  %v293_v41 = vld [vmem:[#allocation2 + $0x420] sm:$0xff] }
  0x78   : > { %994 = vmatpush1.bf16.msra.mxu1 %v993_v42  ;;  %932 = vmatprep.subr.bf16.mxu0 %v931_v43  ;;  %v301_v42 = vld [vmem:[#allocation2 + $0x460] sm:$0xff]  ;;  %v295_v43 = vld [vmem:[#allocation2 + $0x430] sm:$0xff] }
  0x79   : > { %996 = vmatprep.subr.bf16.mxu1 %v995_v47  ;;  %v318_v47 = vld [vmem:[#allocation2 + $0x4e8] sm:$0xff]  ;;  %v953_v50 = vpack.c.bf16 %v301_v42, %v293_v41  ;;  %v1017_v51 = vpack.c.bf16 %v303_v45, %v295_v43  ;;  %v1035_v41 = vpack.c.bf16 %v384_v34, %v376_v33  ;;  %v383_v42 = vld [vmem:[#allocation2 + $0x6f0] sm:$0xff]  ;;  %v392_v45 = vld [vmem:[#allocation2 + $0x738] sm:$0xff] }
  0x7a   : > { %v955_v52 = vpack.c.bf16 %v318_v47, %v310_v46  ;;  %v390_v43 = vld [vmem:[#allocation2 + $0x728] sm:$0xff]  ;;  %v400_v46 = vld [vmem:[#allocation2 + $0x778] sm:$0xff] }
  0x7b   : > { %934 = vmatpush1.bf16.msra.mxu0 %v933_v53  ;;  %v309_v53 = vld [vmem:[#allocation2 + $0x4a0] sm:$0xff] }
  0x7c   : > { %998 = vmatpush1.bf16.msra.mxu1 %v997_v16  ;;  %936 = vmatprep.subr.bf16.mxu0 %v935_v54  ;;  %v317_v16 = vld [vmem:[#allocation2 + $0x4e0] sm:$0xff]  ;;  %v311_v54 = vld [vmem:[#allocation2 + $0x4b0] sm:$0xff] }
  0x7d   : > { %1000 = vmatprep.subr.bf16.mxu1 %v999_v58  ;;  %v334_v58 = vld [vmem:[#allocation2 + $0x568] sm:$0xff]  ;;  %v957_v61 = vpack.c.bf16 %v317_v16, %v309_v53  ;;  %v1021_v62 = vpack.c.bf16 %v319_v56, %v311_v54  ;;  %v1039_v53 = vpack.c.bf16 %v400_v46, %v392_v45  ;;  %v399_v16 = vld [vmem:[#allocation2 + $0x770] sm:$0xff]  ;;  %v408_v56 = vld [vmem:[#allocation2 + $0x7b8] sm:$0xff] }
  0x7e   : > { %v959_v63 = vpack.c.bf16 %v334_v58, %v326_v57  ;;  %v406_v54 = vld [vmem:[#allocation2 + $0x7a8] sm:$0xff]  ;;  %v416_v57 = vld [vmem:[#allocation2 + $0x7f8] sm:$0xff] }
  0x7f   : > { %938 = vmatpush1.bf16.msra.mxu0 %v937_v0  ;;  %v325_v0 = vld [vmem:[#allocation2 + $0x520] sm:$0xff] }
  0x80   : > { %1002 = vmatpush1.bf16.msra.mxu1 %v1001_v1  ;;  %940 = vmatprep.subr.bf16.mxu0 %v939_v2  ;;  %v333_v1 = vld [vmem:[#allocation2 + $0x560] sm:$0xff]  ;;  %v327_v2 = vld [vmem:[#allocation2 + $0x530] sm:$0xff] }
  0x81   : > { %1004 = vmatprep.subr.bf16.mxu1 %v1003_v6  ;;  %v350_v6 = vld [vmem:[#allocation2 + $0x5e8] sm:$0xff]  ;;  %v961_v9 = vpack.c.bf16 %v333_v1, %v325_v0  ;;  %v1025_v10 = vpack.c.bf16 %v335_v4, %v327_v2  ;;  %v407_v0 = vld [vmem:[#allocation2 + $0x7b0] sm:$0xff] }
  0x82   : > { %v963_v11 = vpack.c.bf16 %v350_v6, %v342_v5  ;;  %v415_v1 = vld [vmem:[#allocation2 + $0x7f0] sm:$0xff] }
  0x83   : > { %942 = vmatpush1.bf16.msra.mxu0 %v941_v12  ;;  %v341_v12 = vld [vmem:[#allocation2 + $0x5a0] sm:$0xff] }
  0x84   : > { %1006 = vmatpush1.bf16.msra.mxu1 %v1005_v13  ;;  %944 = vmatprep.subr.bf16.mxu0 %v943_v14  ;;  %v349_v13 = vld [vmem:[#allocation2 + $0x5e0] sm:$0xff]  ;;  %v343_v14 = vld [vmem:[#allocation2 + $0x5b0] sm:$0xff] }
  0x85   : > { %1008 = vmatprep.subr.bf16.mxu1 %v1007_v20  ;;  %v366_v20 = vld [vmem:[#allocation2 + $0x668] sm:$0xff]  ;;  %v965_v23 = vpack.c.bf16 %v349_v13, %v341_v12  ;;  %v1029_v24 = vpack.c.bf16 %v351_v18, %v343_v14 }
  0x86   : > { %v967_v25 = vpack.c.bf16 %v366_v20, %v358_v19 }
  0x87   : > { %946 = vmatpush1.bf16.msra.mxu0 %v945_v26  ;;  %v357_v26 = vld [vmem:[#allocation2 + $0x620] sm:$0xff] }
  0x88   : > { %1010 = vmatpush1.bf16.msra.mxu1 %v1009_v27  ;;  %948 = vmatprep.subr.bf16.mxu0 %v947_v28  ;;  %v365_v27 = vld [vmem:[#allocation2 + $0x660] sm:$0xff]  ;;  %v359_v28 = vld [vmem:[#allocation2 + $0x630] sm:$0xff] }
  0x89   : > { %1012 = vmatprep.subr.bf16.mxu1 %v1011_v32  ;;  %v382_v32 = vld [vmem:[#allocation2 + $0x6e8] sm:$0xff]  ;;  %v969_v35 = vpack.c.bf16 %v365_v27, %v357_v26  ;;  %v1033_v36 = vpack.c.bf16 %v367_v30, %v359_v28 }
  0x8a   : > { %v971_v37 = vpack.c.bf16 %v382_v32, %v374_v31 }
  0x8b   : > { %950 = vmatpush1.bf16.msra.mxu0 %v949_v38  ;;  %v373_v38 = vld [vmem:[#allocation2 + $0x6a0] sm:$0xff] }
  0x8c   : > { %1014 = vmatpush1.bf16.msra.mxu1 %v1013_v39  ;;  %952 = vmatprep.subr.bf16.mxu0 %v951_v40  ;;  %v381_v39 = vld [vmem:[#allocation2 + $0x6e0] sm:$0xff]  ;;  %v375_v40 = vld [vmem:[#allocation2 + $0x6b0] sm:$0xff] }
  0x8d   : > { %1016 = vmatprep.subr.bf16.mxu1 %v1015_v44  ;;  %v398_v44 = vld [vmem:[#allocation2 + $0x768] sm:$0xff]  ;;  %v973_v47 = vpack.c.bf16 %v381_v39, %v373_v38  ;;  %v1037_v48 = vpack.c.bf16 %v383_v42, %v375_v40 }
  0x8e   : > { %v975_v49 = vpack.c.bf16 %v398_v44, %v390_v43 }
  0x8f   : > { %954 = vmatpush1.bf16.msra.mxu0 %v953_v50  ;;  %v389_v50 = vld [vmem:[#allocation2 + $0x720] sm:$0xff] }
  0x90   : > { %1018 = vmatpush1.bf16.msra.mxu1 %v1017_v51  ;;  %956 = vmatprep.subr.bf16.mxu0 %v955_v52  ;;  %v397_v51 = vld [vmem:[#allocation2 + $0x760] sm:$0xff]  ;;  %v391_v52 = vld [vmem:[#allocation2 + $0x730] sm:$0xff] }
  0x91   : > { %1020 = vmatprep.subr.bf16.mxu1 %v1019_v55  ;;  %v414_v55 = vld [vmem:[#allocation2 + $0x7e8] sm:$0xff]  ;;  %v977_v58 = vpack.c.bf16 %v397_v51, %v389_v50  ;;  %v1041_v59 = vpack.c.bf16 %v399_v16, %v391_v52 }
  0x92   : > { %v979_v60 = vpack.c.bf16 %v414_v55, %v406_v54 }
  0x93   : > { %958 = vmatpush1.bf16.msra.mxu0 %v957_v61  ;;  %v405_v61 = vld [vmem:[#allocation2 + $0x7a0] sm:$0xff] }
  0x94   : > { %1022 = vmatpush1.bf16.msra.mxu1 %v1021_v62  ;;  %960 = vmatprep.subr.bf16.mxu0 %v959_v63  ;;  %v413_v62 = vld [vmem:[#allocation2 + $0x7e0] sm:$0xff]  ;;  %v1043_v63 = vpack.c.bf16 %v416_v57, %v408_v56 }
  0x95   : > { %1024 = vmatprep.subr.bf16.mxu1 %v1023_v3  ;;  %v981_v2 = vpack.c.bf16 %v413_v62, %v405_v61  ;;  %v1045_v3 = vpack.c.bf16 %v415_v1, %v407_v0 }
  0x97   : > { %962 = vmatpush1.bf16.msra.mxu0 %v961_v9 }
  0x98   : > { %1026 = vmatpush1.bf16.msra.mxu1 %v1025_v10  ;;  %964 = vmatprep.subr.bf16.mxu0 %v963_v11 }
  0x99   : > { %1028 = vmatprep.subr.bf16.mxu1 %v1027_v17 }
  0x9b   : > { %966 = vmatpush1.bf16.msra.mxu0 %v965_v23 }
  0x9c   : > { %1030 = vmatpush1.bf16.msra.mxu1 %v1029_v24  ;;  %968 = vmatprep.subr.bf16.mxu0 %v967_v25 }
  0x9d   : > { %1032 = vmatprep.subr.bf16.mxu1 %v1031_v29 }
  0x9f   : > { %970 = vmatpush1.bf16.msra.mxu0 %v969_v35 }
  0xa0   : > { %1034 = vmatpush1.bf16.msra.mxu1 %v1033_v36  ;;  %972 = vmatprep.subr.bf16.mxu0 %v971_v37 }
  0xa1   : > { %1036 = vmatprep.subr.bf16.mxu1 %v1035_v41 }
  0xa3   : > { %974 = vmatpush1.bf16.msra.mxu0 %v973_v47 }
  0xa4   : > { %1038 = vmatpush1.bf16.msra.mxu1 %v1037_v48  ;;  %976 = vmatprep.subr.bf16.mxu0 %v975_v49 }
  0xa5   : > { %1040 = vmatprep.subr.bf16.mxu1 %v1039_v53 }
  0xa7   : > { %978 = vmatpush1.bf16.msra.mxu0 %v977_v58 }
  0xa8   : > { %1042 = vmatpush1.bf16.msra.mxu1 %v1041_v59  ;;  %980 = vmatprep.subr.bf16.mxu0 %v979_v60 }
  0xa9   : > { %1044 = vmatprep.subr.bf16.mxu1 %v1043_v63 }
  0xab   : > { %982 = vmatpush1.bf16.msra.mxu0 %v981_v2 }
  0xac   : > { %1046 = vmatpush1.bf16.msra.mxu1 %v1045_v3 }
  0xae   : > { %624 = vmatmul.mubr.f32.vlgmr.msra.gmra.mrb[2].mxu0 %v1189_v15 }
  0xaf   : > { %695 = vmatmul.mubr.f32.vlgmr.msra.gmra.mrb[2].mxu1 %v1189_v15 }
 0x141   : > { %v483_v4 = vpop.f32.mrb[0].mxu0 }
 0x142   : > { %701 = vst [vmem:[%s158_s6] sm:$0xff] %v483_v4  ;;  %v554_v5 = vpop.f32.mrb[0].mxu1  ;;  %v485_v6 = vpop.f32.mrb[1].mxu0 }
 0x143   : > { %703 = vst [vmem:[%s158_s6 + $0x10] sm:$0xff] %v554_v5  ;;  %702 = vst [vmem:[%s158_s6 + $0x8] sm:$0xff] %v485_v6  ;;  %v556_v7 = vpop.f32.mrb[1].mxu1 }
 0x144   : > { %704 = vst [vmem:[%s158_s6 + $0x18] sm:$0xff] %v556_v7 }
 0x181   : > { %v625_v8 = vpop.f32.mrb[2].mxu0 }
 0x182   : > { %705 = vst [vmem:[%s158_s6 + $0x20] sm:$0xff] %v625_v8  ;;  %v696_v9 = vpop.f32.mrb[2].mxu1  ;;  %v627_v10 = vpop.f32.mrb[3].mxu0 }
 0x183   : > { %707 = vst [vmem:[%s158_s6 + $0x30] sm:$0xff] %v696_v9  ;;  %706 = vst [vmem:[%s158_s6 + $0x28] sm:$0xff] %v627_v10  ;;  %v698_v15 = vpop.f32.mrb[3].mxu1 }
 0x184   : > { %708 = vst [vmem:[%s158_s6 + $0x38] sm:$0xff] %v698_v15 }
 0x185 PF: > { %s13_s9 = sadd.s32 1, %s1106_s9  }
 0x186   : > { %p10_p3 = scmp.ge.s32.totalorder %s13_s9, 4  }
 0x188   :  { %12 = sbr.rel (!%p10_p3) target bundleno = 1 (0x1), region = 63 }
 0x18f   :  { %730 = vsyncpa [#allocation3], 1 }
 0x190   :  { %732 = vsyncpa [#allocation3 + $0x1], 1 }

</bundles_post_ra>
